<compile_context>
chip_gen: v7x
topology: tpu7x:2x2x1
jax: 0.10.0
libtpu: 0.0.40
codegen_flags: <defaults>
</compile_context>

<pallas_src>
import functools

import jax
import jax.numpy as jnp
import numpy as np
from jax.experimental import pallas as pl
from jax.experimental.pallas import tpu as pltpu

_LANE = 128
_SUBLANE = 8
_VMEM_LIMIT_BYTES = 48 * 1024 * 1024     # v7x has 64 MiB/TC physical; leave headroom
_STATS_BLOCK_BYTES = 16 * 1024 * 1024    # pass-1 x block (double-buffered -> ~32 MiB)
_APPLY_BLOCK_BYTES = 8 * 1024 * 1024     # pass-2 x / out blocks (-> ~32 MiB total)


def _round_up(a, b):
    return (a + b - 1) // b * b


def _plan_tiles(rows, hw, itemsize, block_bytes):
    """Pick (row_block, lane_tile) for a (rows, hw) array.

    lane_tile is a multiple of 128 (whole 128-aligned rows when they fit the
    budget with >= 8 rows); row_block is a multiple of 8 (or the full row
    count).  One block is at most ~block_bytes; Pallas double-buffers on top.
    """
    hw_al = _round_up(hw, _LANE)
    max_elems = max(_SUBLANE * _LANE, block_bytes // itemsize)
    t = min(hw_al, max(_LANE, (max_elems // _SUBLANE) // _LANE * _LANE))
    rb = max_elems // t
    if rb >= rows:
        rb = rows
    else:
        rb = max(_SUBLANE, (rb // _SUBLANE) * _SUBLANE)
    return rb, t


def _stats_kernel(x_ref, sum_ref, sq_ref, *, hw, lane_tile, needs_mask):
    # x_ref: (RB, T) tile; sum_ref / sq_ref: (RB, 1) accumulators, resident in
    # VMEM across the last ("arbitrary") grid axis.
    k = pl.program_id(1)

    @pl.when(k == 0)
    def _init():
        sum_ref[...] = jnp.zeros_like(sum_ref)
        sq_ref[...] = jnp.zeros_like(sq_ref)

    x = x_ref[...].astype(jnp.float32)
    if needs_mask:
        # Ragged HW tail: out-of-bounds lanes of the last tile hold garbage;
        # zero them so they are sum / sum-of-squares neutral (mean divides by
        # the true HW).  Garbage rows of a ragged row block stay confined to
        # their own rows and are dropped on the out-of-bounds output write.
        col = jax.lax.broadcasted_iota(jnp.int32, x.shape, 1) + k * lane_tile
        x = jnp.where(col < hw, x, 0.0)
    sum_ref[...] += jnp.sum(x, axis=-1, keepdims=True)
    sq_ref[...] += jnp.sum(x * x, axis=-1, keepdims=True)


def _apply_kernel(x_ref, scale_ref, shift_ref, o_ref):
    # x_ref / o_ref: (RB, T); scale_ref / shift_ref: (RB, 1).
    if x_ref.dtype == jnp.bfloat16:
        # v6e / v7x have a bf16 VALU: stay in bf16 (halves vreg pressure and
        # cast work).  On v5e the compiler falls back to f32 internally.
        s = scale_ref[...].astype(jnp.bfloat16)
        t = shift_ref[...].astype(jnp.bfloat16)
        o_ref[...] = (x_ref[...] * s + t).astype(o_ref.dtype)
    else:
        x = x_ref[...].astype(jnp.float32)
        o_ref[...] = (x * scale_ref[...] + shift_ref[...]).astype(o_ref.dtype)


def switch_norm_2d(x, mean_weight, var_weight, weight, bias, eps=1e-5):
    """SwitchNorm2d forward (using_bn=True, training=True, affine=True)."""
    N, C, H, W = x.shape
    HW = H * W
    R = N * C
    itemsize = x.dtype.itemsize

    # Contiguous view of the NCHW layout -- free reshape, no copy.
    x2 = x.reshape(R, HW)

    # ---- Pass 1: streaming per-(n,c) sum / sum-of-squares -------------------
    rb1, t1 = _plan_tiles(R, HW, itemsize, _STATS_BLOCK_BYTES)
    grid1 = (pl.cdiv(R, rb1), pl.cdiv(HW, t1))
    needs_mask = (HW % t1) != 0

    sums, sqs = pl.pallas_call(
        functools.partial(_stats_kernel, hw=HW, lane_tile=t1,
                          needs_mask=needs_mask),
        out_shape=(jax.ShapeDtypeStruct((R, 1), jnp.float32),
                   jax.ShapeDtypeStruct((R, 1), jnp.float32)),
        grid=grid1,
        in_specs=[pl.BlockSpec((rb1, t1), lambda r, k: (r, k))],
        out_specs=(pl.BlockSpec((rb1, 1), lambda r, k: (r, 0)),
                   pl.BlockSpec((rb1, 1), lambda r, k: (r, 0))),
        compiler_params=pltpu.CompilerParams(
            dimension_semantics=("parallel", "arbitrary"),
            vmem_limit_bytes=_VMEM_LIMIT_BYTES),
    )(x2)

    # ---- Finalize (tiny, O(N*C)): IN/LN/BN blend -> folded scale / shift ----
    f32 = jnp.float32
    mean_in = (sums / HW).reshape(N, C).astype(f32)
    ex2 = (sqs / HW).reshape(N, C).astype(f32)
    # torch.Tensor.var defaults to unbiased (divisor HW - 1); guard HW == 1.
    bessel = HW / max(HW - 1.0, 1.0)
    var_in = (ex2 - mean_in * mean_in) * bessel
    temp = var_in + mean_in * mean_in

    mean_ln = jnp.mean(mean_in, axis=1, keepdims=True)
    var_ln = jnp.mean(temp, axis=1, keepdims=True) - mean_ln * mean_ln
    mean_bn = jnp.mean(mean_in, axis=0, keepdims=True)
    var_bn = jnp.mean(temp, axis=0, keepdims=True) - mean_bn * mean_bn

    mw = jax.nn.softmax(mean_weight.astype(f32))
    vw = jax.nn.softmax(var_weight.astype(f32))
    mean = mw[0] * mean_in + mw[1] * mean_ln + mw[2] * mean_bn
    var = vw[0] * var_in + vw[1] * var_ln + vw[2] * var_bn
    # Guard E[x^2] - mean^2 cancellation going slightly negative (deviates
    # from PyTorch only in the pathological negative-variance case).
    var = jnp.maximum(var, 0.0)

    w = weight.reshape(1, C).astype(f32)
    b = bias.reshape(1, C).astype(f32)
    inv_std = jax.lax.rsqrt(var + eps)
    scale = (w * inv_std).reshape(R, 1)
    shift = (b - mean * w * inv_std).reshape(R, 1)

    # TODO(synk): running_mean / running_var momentum buffer updates (training
    # side effect, not part of the returned activation) are not materialized.
    # TODO(synk): fused single-pallas_call fast path (x resident in VMEM) when
    # the whole tensor fits, saving the second HBM read of x.

    # ---- Pass 2: out = x * scale + shift ------------------------------------
    rb2, t2 = _plan_tiles(R, HW, itemsize, _APPLY_BLOCK_BYTES)
    grid2 = (pl.cdiv(R, rb2), pl.cdiv(HW, t2))

    out2 = pl.pallas_call(
        _apply_kernel,
        out_shape=jax.ShapeDtypeStruct((R, HW), x.dtype),
        grid=grid2,
        in_specs=[pl.BlockSpec((rb2, t2), lambda r, k: (r, k)),
                  pl.BlockSpec((rb2, 1), lambda r, k: (r, 0)),
                  pl.BlockSpec((rb2, 1), lambda r, k: (r, 0))],
        out_specs=pl.BlockSpec((rb2, t2), lambda r, k: (r, k)),
        compiler_params=pltpu.CompilerParams(
            dimension_semantics=("parallel", "parallel"),
            vmem_limit_bytes=_VMEM_LIMIT_BYTES),
    )(x2, scale, shift)

    return out2.reshape(N, C, H, W)


def _reference(x, mean_weight, var_weight, weight, bias, eps=1e-5):
    N, C, H, W = x.shape
    xr = x.reshape(N, C, -1).astype(jnp.float32)
    mean_in = jnp.mean(xr, axis=-1, keepdims=True)
    var_in = jnp.var(xr, axis=-1, keepdims=True, ddof=1)
    mean_ln = jnp.mean(mean_in, axis=1, keepdims=True)
    temp = var_in + mean_in ** 2
    var_ln = jnp.mean(temp, axis=1, keepdims=True) - mean_ln ** 2
    mean_bn = jnp.mean(mean_in, axis=0, keepdims=True)
    var_bn = jnp.mean(temp, axis=0, keepdims=True) - mean_bn ** 2
    mw = jax.nn.softmax(mean_weight)
    vw = jax.nn.softmax(var_weight)
    mean = mw[0] * mean_in + mw[1] * mean_ln + mw[2] * mean_bn
    var = vw[0] * var_in + vw[1] * var_ln + vw[2] * var_bn
    xn = (xr - mean) / jnp.sqrt(var + eps)
    xn = xn.reshape(N, C, H, W)
    return xn * weight.astype(jnp.float32) + bias.astype(jnp.float32)


def _run_case(key, n, c, h, w, dtype, rtol, atol):
    x = jax.random.normal(key, (n, c, h, w), dtype=jnp.float32).astype(dtype)
    # Deterministic parameter init matching SwitchNorm2d.reset_parameters:
    weight = jnp.ones((1, c, 1, 1), dtype=jnp.float32)
    bias = jnp.zeros((1, c, 1, 1), dtype=jnp.float32)
    mean_weight = jnp.ones((3,), dtype=jnp.float32)
    var_weight = jnp.ones((3,), dtype=jnp.float32)

    out = switch_norm_2d(x, mean_weight, var_weight, weight, bias, eps=1e-5)
    out = jax.block_until_ready(out)

    ref = _reference(x.astype(jnp.float32), mean_weight, var_weight,
                     weight, bias, eps=1e-5)
    np.testing.assert_allclose(np.asarray(out, dtype=np.float32),
                               np.asarray(ref), rtol=rtol, atol=atol)


if __name__ == "__main__":
    k1, k2, k3 = jax.random.split(jax.random.PRNGKey(0), 3)

    # Aligned shape (HW multiple of 128).
    _run_case(k1, 2, 4, 16, 16, jnp.float32, rtol=1e-5, atol=2e-5)
    # Ragged HW (225) and rows not a multiple of 8: exercised without any
    # host-side pad / slice (in-kernel tail masking + OOB writes dropped).
    _run_case(k2, 2, 5, 15, 15, jnp.float32, rtol=1e-5, atol=2e-5)
    # bf16 input: pass 2 stays in bf16, stats accumulate in f32.
    _run_case(k3, 2, 4, 16, 16, jnp.bfloat16, rtol=3e-2, atol=3e-2)

    print("KERNEL_OK")
</pallas_src>

<mosaic_0001>
module attributes {stable_mosaic.version = 11 : i64} {
  func.func @_stats_kernel(%arg0: i32, %arg1: i32, %arg2: memref<8x256xf32, #tpu.memory_space<vmem>>, %arg3: memref<8x1xf32, #tpu.memory_space<vmem>>, %arg4: memref<8x1xf32, #tpu.memory_space<vmem>>) attributes {dimension_semantics = [#tpu.dimension_semantics<parallel>, #tpu.dimension_semantics<arbitrary>], iteration_bounds = array<i64: 1, 1>, scalar_prefetch = 0 : i64, scratch_operands = 0 : i64, tpu.core_type = #tpu.core_type<tc>, window_params = [{transform_indices = @transform_0, window_bounds = array<i64: 8, 256>}, {transform_indices = @transform_1, window_bounds = array<i64: 8, 1>}, {transform_indices = @transform_2, window_bounds = array<i64: 8, 1>}]} {
    %c0_i32 = arith.constant 0 : i32
    %0 = arith.cmpi eq, %arg1, %c0_i32 : i32
    %1 = arith.extui %0 : i1 to i32
    %c0_i32_0 = arith.constant 0 : i32
    %2 = arith.cmpi ne, %1, %c0_i32_0 : i32
    scf.if %2 {
      %cst_11 = arith.constant 0.000000e+00 : f32
      %15 = vector.broadcast %cst_11 : f32 to vector<8x1xf32>
      %c0_12 = arith.constant 0 : index
      %c0_13 = arith.constant 0 : index
      %16 = vector.load %arg3[%c0_12, %c0_13] : memref<8x1xf32, #tpu.memory_space<vmem>>, vector<8x1xf32>
      tpu.vector_store %arg3[%c0_12, %c0_13], %15 {strides = array<i32>} : memref<8x1xf32, #tpu.memory_space<vmem>>, vector<8x1xf32>,
      %cst_14 = arith.constant 0.000000e+00 : f32
      %17 = vector.broadcast %cst_14 : f32 to vector<8x1xf32>
      %c0_15 = arith.constant 0 : index
      %c0_16 = arith.constant 0 : index
      %18 = vector.load %arg4[%c0_15, %c0_16] : memref<8x1xf32, #tpu.memory_space<vmem>>, vector<8x1xf32>
      tpu.vector_store %arg4[%c0_15, %c0_16], %17 {strides = array<i32>} : memref<8x1xf32, #tpu.memory_space<vmem>>, vector<8x1xf32>,
    } else {
    }
    %c0 = arith.constant 0 : index
    %c0_1 = arith.constant 0 : index
    %3 = vector.load %arg2[%c0, %c0_1] : memref<8x256xf32, #tpu.memory_space<vmem>>, vector<8x256xf32>
    %c0_2 = arith.constant 0 : index
    %c0_3 = arith.constant 0 : index
    %4 = vector.load %arg3[%c0_2, %c0_3] : memref<8x1xf32, #tpu.memory_space<vmem>>, vector<8x1xf32>
    %cst = arith.constant dense<0.000000e+00> : vector<8xf32>
    %5 = vector.multi_reduction <add>, %3, %cst [1] : vector<8x256xf32> to vector<8xf32>
    %6 = vector.shape_cast %5 : vector<8xf32> to vector<8x1xf32>
    %7 = arith.addf %4, %6 : vector<8x1xf32>
    %c0_4 = arith.constant 0 : index
    %c0_5 = arith.constant 0 : index
    %8 = vector.load %arg3[%c0_4, %c0_5] : memref<8x1xf32, #tpu.memory_space<vmem>>, vector<8x1xf32>
    tpu.vector_store %arg3[%c0_4, %c0_5], %7 {strides = array<i32>} : memref<8x1xf32, #tpu.memory_space<vmem>>, vector<8x1xf32>,
    %c0_6 = arith.constant 0 : index
    %c0_7 = arith.constant 0 : index
    %9 = vector.load %arg4[%c0_6, %c0_7] : memref<8x1xf32, #tpu.memory_space<vmem>>, vector<8x1xf32>
    %10 = arith.mulf %3, %3 : vector<8x256xf32>
    %cst_8 = arith.constant dense<0.000000e+00> : vector<8xf32>
    %11 = vector.multi_reduction <add>, %10, %cst_8 [1] : vector<8x256xf32> to vector<8xf32>
    %12 = vector.shape_cast %11 : vector<8xf32> to vector<8x1xf32>
    %13 = arith.addf %9, %12 : vector<8x1xf32>
    %c0_9 = arith.constant 0 : index
    %c0_10 = arith.constant 0 : index
    %14 = vector.load %arg4[%c0_9, %c0_10] : memref<8x1xf32, #tpu.memory_space<vmem>>, vector<8x1xf32>
    tpu.vector_store %arg4[%c0_9, %c0_10], %13 {strides = array<i32>} : memref<8x1xf32, #tpu.memory_space<vmem>>, vector<8x1xf32>,
    return
  }
  func.func @transform_0(%arg0: i32, %arg1: i32) -> (i32, i32) {
    %c0_i32 = arith.constant 0 : i32
    return %arg0, %arg1 : i32, i32
  }
  func.func @transform_1(%arg0: i32, %arg1: i32) -> (i32, i32) {
    %c0_i32 = arith.constant 0 : i32
    %c0_i32_0 = arith.constant 0 : i32
    return %arg0, %c0_i32 : i32, i32
  }
  func.func @transform_2(%arg0: i32, %arg1: i32) -> (i32, i32) {
    %c0_i32 = arith.constant 0 : i32
    %c0_i32_0 = arith.constant 0 : i32
    return %arg0, %c0_i32 : i32, i32
  }
}

</mosaic_0001>

<bundles_post_ra>
// kernel: tpu_custom_call.1
= control target key start
LH: loop header
LB: loop body
LE: loop exit
PB: predicated region body
PF: predicated region fallthrough
CT: control target
= control target key end

     0   :  { %8 = vsyncpa [#allocation3], 0  ;;  %s81_s9 = smov [#allocation2]   ;;  %s132_s0 = inlined_call_operand.hbm [shape: f32[8,256], index: 0, kind: input, shape index: {}]   ;;  %s133_s1 = inlined_call_operand.vmem [shape: f32[8,1], index: 1, kind: output, shape index: {0}]   ;;  %s134_s2 = inlined_call_operand.vmem [shape: f32[8,1], index: 2, kind: output, shape index: {1}]  }
   0x1   :  { %s15_s10 = sshll.u32 %s81_s9, 4  ;;  %s57_s13 = scalar_lea.hbm %s132_s0, 256  ;;  %s16_s10 = int_to_ptr.vmem [resolvable:$true] %s15_s10 }
   0x2   :  { %p58_p0 = scmp.ne.s32.totalorder %s132_s0, %s57_s13  ;;  %p61_p1 = scmp.lt.u32.totalorder %s57_s13, %s132_s0 }
   0x4   :  { %p63_p2 = pnand %p61_p1, %p58_p0 }
   0x6   :  { %66 = shalt.err (!%p63_p2)
}
   0x7   :  { %s67_s18 = scalar_lea.vmem %s16_s10, 256  ;;  %p72_p4 = scmp.lt.s32.totalorder %s16_s10, %s16_s10 }
   0x8   :  { %p68_p3 = scmp.ne.s32.totalorder %s16_s10, %s67_s18  ;;  %p73_p5 = scmp.lt.s32.totalorder %s67_s18, %s67_s18 }
   0xa   :  { %p74_p6 = por %p73_p5, %p72_p4 }
   0xc   :  { %p75_p7 = pnand %p74_p6, %p68_p3 }
   0xe   :  { %78 = shalt.err (!%p75_p7)
}
   0xf   :  { %18 = dma.hbm_to_vmem [thread:$0]  %s132_s0, 256, %s16_s10, [#allocation3]  }
  0x10   :  { %79 = dma.done.wait [#allocation3], 256  }
  0x11   :  { %80 = vsyncadd [#allocation3], 4294967040  ;;  %vm26_vm0 = vcmask 7168   ;;  %v82_v0 = vmov 0.0   ;;  %v29_v1 = vld [vmem:[#allocation2] sm:$0xff]  ;;  %v30_v2 = vld [vmem:[#allocation2 + $0x8] sm:$0xff] }
  0x12   :  { %27 = vst.msk [vmem:[%s133_s1] sm:$0xff] %vm26_vm0, %v82_v0  ;;  %28 = vst.msk [vmem:[%s134_s2] sm:$0xff] %vm26_vm0, %v82_v0  ;;  %v32_v3 = vadd.f32 %v30_v2, %v29_v1  ;;  %v39_v4 = vmul.f32 %v29_v1, %v29_v1  ;;  %v40_v5 = vmul.f32 %v30_v2, %v30_v2 }
  0x14   :  { %33 = vadd.xlane.f32.xlu0 %v32_v3  ;;  %v41_v6 = vadd.f32 %v40_v5, %v39_v4 }
  0x18   :  { %42 = vadd.xlane.f32.xlu0 %v41_v6 }
  0x19   :  { %v31_v7 = vld [vmem:[%s133_s1] sm:$0xff] }
  0x1a   :  { %v38_v10 = vld [vmem:[%s134_s2] sm:$0xff] }
  0xa1   :  { %v34_v8 = vpop.xlane.xlu0 %33 }
  0xa2   :  { %v35_v9 = vadd.f32 %v34_v8, %v31_v7 }
  0xa4   :  { %37 = vst.msk [vmem:[%s133_s1] sm:$0xff] %vm26_vm0, %v35_v9 }
  0xa5   :  { %v43_v11 = vpop.xlane.xlu0 %42 }
  0xa6   :  { %v44_v12 = vadd.f32 %v43_v11, %v38_v10 }
  0xa8   :  { %45 = vst.msk [vmem:[%s134_s2] sm:$0xff] %vm26_vm0, %v44_v12 }
  0xa9   :  { %54 = vsyncpa [#allocation3], 1 }

</bundles_post_ra>
